<compile_context>
chip_gen: v6e
topology: v6e:2x2x1
jax: 0.10.0
libtpu: 0.0.40
codegen_flags: <defaults>
</compile_context>

<pallas_src>
import functools
from typing import NamedTuple

import jax
import jax.numpy as jnp
from jax.experimental import pallas as pl
from jax.experimental.pallas import tpu as pltpu


def _round_up(a: int, b: int) -> int:
    return ((a + b - 1) // b) * b


def _vmem_capacity_bytes() -> int:
    try:
        return int(pltpu.get_tpu_info().vmem_capacity_bytes)
    except Exception:
        return 64 << 20  # conservative fallback (v7x per-TensorCore size)


# --------------------------------------------------------------------------
# Kernels
# --------------------------------------------------------------------------
def _ffn_resident_kernel(x_ref, w13_ref, w2t_ref, o_ref, *scratch,
                         chunk, n_chunks, acc_in_out):
    """Whole weight set resident in VMEM (single-buffered, loaded once).

    Grid: (row tiles,).  The hidden reduction is chunked inside the kernel so
    f32 intermediates stay bounded at (tm, 2*chunk)."""
    acc_ref = o_ref if acc_in_out else scratch[0]
    x = x_ref[...].astype(w13_ref.dtype)          # cast to bf16 in-kernel
    acc_ref[...] = jnp.zeros_like(acc_ref)

    def body(k, carry):
        c0 = pl.multiple_of(k * (2 * chunk), 2 * chunk)
        r0 = pl.multiple_of(k * chunk, chunk)
        # Fused [W1^T chunk | W3^T chunk] -> one MXU pass.
        hh = jnp.dot(x, w13_ref[:, pl.ds(c0, 2 * chunk)],
                     preferred_element_type=jnp.float32)
        h1 = hh[:, :chunk]
        h3 = hh[:, chunk:]
        # SiLU(h1) * h3 in f32; denominator reciprocal on the EUP.
        gate = h1 * pl.reciprocal(1.0 + jnp.exp(-h1), approx=True)
        gated = (gate * h3).astype(w2t_ref.dtype)   # single downcast for MXU
        acc_ref[...] += jnp.dot(gated, w2t_ref[pl.ds(r0, chunk), :],
                                preferred_element_type=jnp.float32)
        return carry

    jax.lax.fori_loop(0, n_chunks, body, 0, unroll=(n_chunks <= 4))

    if not acc_in_out:
        o_ref[...] = acc_ref[...].astype(o_ref.dtype)


def _ffn_streamed_kernel(x_ref, w13_ref, w2t_ref, o_ref, *scratch,
                         chunk, acc_in_out):
    """Weights streamed per hidden tile.  Grid: (row tiles, hidden tiles)."""
    acc_ref = o_ref if acc_in_out else scratch[0]
    h = pl.program_id(1)

    @pl.when(h == 0)
    def _():
        acc_ref[...] = jnp.zeros_like(acc_ref)

    x = x_ref[...].astype(w13_ref.dtype)
    hh = jnp.dot(x, w13_ref[...], preferred_element_type=jnp.float32)
    h1 = hh[:, :chunk]
    h3 = hh[:, chunk:]
    gate = h1 * pl.reciprocal(1.0 + jnp.exp(-h1), approx=True)
    gated = (gate * h3).astype(w2t_ref.dtype)
    acc_ref[...] += jnp.dot(gated, w2t_ref[...],
                            preferred_element_type=jnp.float32)

    if not acc_in_out:
        @pl.when(h == pl.num_programs(1) - 1)
        def _():
            o_ref[...] = acc_ref[...].astype(o_ref.dtype)


# --------------------------------------------------------------------------
# Weight preparation (one-time; hoisted out of the hot path)
# --------------------------------------------------------------------------
class PreparedFFN(NamedTuple):
    w13: jax.Array        # (dim, 2*hidden_pad), chunk-interleaved [w1 | w3]
    w2t: jax.Array        # (hidden_pad, dim)
    dim: int
    hidden_pad: int
    chunk: int
    resident: bool
    compute_dtype: jnp.dtype


def prepare_ffn_weights(w1, w2, w3, *, compute_dtype=jnp.bfloat16):
    """Transpose / cast / fuse nn.Linear weights once.

    w1: (hidden, dim), w2: (dim, hidden), w3: (hidden, dim)."""
    hidden, dim = w1.shape
    assert w3.shape == (hidden, dim) and w2.shape == (dim, hidden)
    w_isz = jnp.dtype(compute_dtype).itemsize

    hidden_pad = _round_up(hidden, 128)       # zero-pad: contributes 0 to out
    vmem_cap = _vmem_capacity_bytes()

    weight_bytes = 3 * dim * hidden_pad * w_isz
    resident = weight_bytes <= vmem_cap // 4  # ~16 MiB v7x, ~32 MiB v5e/v6e

    # hidden chunk: bounds in-kernel intermediates (resident path) / weight
    # tile width (streamed path).  Multiple of 128, divides hidden_pad.
    target = 512 if (resident or vmem_cap > (80 << 20)) else 256  # v7x -> 256
    chunk = min(target, hidden_pad)
    while hidden_pad % chunk != 0:
        chunk -= 128
    assert chunk >= 128 and chunk % 128 == 0

    w1t = w1.T.astype(compute_dtype)
    w3t = w3.T.astype(compute_dtype)
    w2t = w2.T.astype(compute_dtype)
    if hidden_pad != hidden:
        pad = hidden_pad - hidden
        w1t = jnp.pad(w1t, ((0, 0), (0, pad)))
        w3t = jnp.pad(w3t, ((0, 0), (0, pad)))
        w2t = jnp.pad(w2t, ((0, pad), (0, 0)))

    nb = hidden_pad // chunk
    # Chunk-interleave so each (dim, 2*chunk) slab = [w1 chunk k | w3 chunk k].
    w13 = jnp.stack(
        [w1t.reshape(dim, nb, chunk), w3t.reshape(dim, nb, chunk)], axis=2
    ).reshape(dim, 2 * hidden_pad)

    return PreparedFFN(w13, w2t, dim, hidden_pad, chunk, resident,
                       jnp.dtype(compute_dtype))


# --------------------------------------------------------------------------
# Forward
# --------------------------------------------------------------------------
def feed_forward_prepared(x, prepared: PreparedFFN):
    """SwiGLU FFN forward.  x: (..., dim) -> (..., dim) in x.dtype."""
    orig_shape = x.shape
    dim = prepared.dim
    assert orig_shape[-1] == dim
    x2d = x.reshape(-1, dim)
    M = x2d.shape[0]
    out_dtype = x.dtype

    hidden_pad = prepared.hidden_pad
    chunk = prepared.chunk
    resident = prepared.resident
    w_isz = jnp.dtype(prepared.compute_dtype).itemsize
    x_isz = jnp.dtype(x.dtype).itemsize
    o_isz = jnp.dtype(out_dtype).itemsize
    acc_in_out = (out_dtype == jnp.float32)   # accumulate directly into o_ref

    vmem_cap = _vmem_capacity_bytes()
    budget = int(0.80 * vmem_cap)
    weight_vmem = 3 * dim * hidden_pad * w_isz if resident else 0

    def est(tm):
        xb = 2 * tm * dim * x_isz                         # 2x-buffered x tile
        ob = 2 * tm * dim * o_isz                         # 2x-buffered out tile
        ab = 0 if acc_in_out else tm * dim * 4            # f32 accumulator
        if resident:
            wb = weight_vmem                              # single-buffered
        else:
            wb = 2 * (2 * dim * chunk + chunk * dim) * w_isz
        inter = 4 * tm * (2 * chunk) * 4                  # hh + gating temps
        return xb + ob + ab + wb + inter + (2 << 20)

    tm = 128
    for cand in (1024, 768, 512, 384, 256, 128):
        if est(cand) <= budget:
            tm = cand
            break

    tm_eff = min(tm, _round_up(M, 8))
    # Keep >= 2 row tiles when M allows it so both v7x TensorCores get work.
    while tm_eff >= 256 and _round_up(M, tm_eff) // tm_eff < 2:
        tm_eff //= 2
    M_pad = _round_up(M, tm_eff)
    if M_pad != M:
        x2d = jnp.pad(x2d, ((0, M_pad - M), (0, 0)))

    n_rows = M_pad // tm_eff
    nb = hidden_pad // chunk

    vmem_limit = int(min(max(est(tm_eff) + (8 << 20), 32 << 20),
                         int(0.85 * vmem_cap)))

    weight_hbm = 3 * dim * hidden_pad * w_isz
    cost = pl.CostEstimate(
        flops=6 * M_pad * dim * hidden_pad,
        transcendentals=M_pad * hidden_pad,
        bytes_accessed=(M_pad * dim * x_isz
                        + M_pad * dim * o_isz
                        + weight_hbm * (1 if resident else n_rows)),
    )

    scratch_shapes = [] if acc_in_out else [pltpu.VMEM((tm_eff, dim), jnp.float32)]

    if resident:
        kernel = functools.partial(_ffn_resident_kernel, chunk=chunk,
                                   n_chunks=nb, acc_in_out=acc_in_out)
        grid = (n_rows,)
        in_specs = [
            pl.BlockSpec((tm_eff, dim), lambda i: (i, 0)),
            # Untiled VMEM placement: loaded once, single-buffered, resident
            # across all row tiles (equivalent to Buffered(1)).
            pl.BlockSpec(memory_space=pltpu.MemorySpace.VMEM),
            pl.BlockSpec(memory_space=pltpu.MemorySpace.VMEM),
        ]
        out_specs = pl.BlockSpec((tm_eff, dim), lambda i: (i, 0))
        dims = ("parallel",)
    else:
        kernel = functools.partial(_ffn_streamed_kernel, chunk=chunk,
                                   acc_in_out=acc_in_out)
        grid = (n_rows, nb)
        in_specs = [
            pl.BlockSpec((tm_eff, dim), lambda i, h: (i, 0)),
            pl.BlockSpec((dim, 2 * chunk), lambda i, h: (0, h)),
            pl.BlockSpec((chunk, dim), lambda i, h: (h, 0)),
        ]
        out_specs = pl.BlockSpec((tm_eff, dim), lambda i, h: (i, 0))
        dims = ("parallel", "arbitrary")

    out = pl.pallas_call(
        kernel,
        out_shape=jax.ShapeDtypeStruct((M_pad, dim), out_dtype),
        grid_spec=pltpu.PrefetchScalarGridSpec(
            num_scalar_prefetch=0,
            grid=grid,
            in_specs=in_specs,
            out_specs=out_specs,
            scratch_shapes=scratch_shapes,
        ),
        compiler_params=pltpu.CompilerParams(
            dimension_semantics=dims,
            vmem_limit_bytes=vmem_limit,
        ),
        cost_estimate=cost,
    )(x2d, prepared.w13, prepared.w2t)

    if M_pad != M:
        out = out[:M]
    return out.reshape(orig_shape)


def feed_forward(x, w1, w2, w3, *, compute_dtype=jnp.bfloat16):
    """One-shot convenience.  For repeated calls (the hot path) call
    prepare_ffn_weights() once and reuse it with feed_forward_prepared()."""
    return feed_forward_prepared(
        x, prepare_ffn_weights(w1, w2, w3, compute_dtype=compute_dtype))


def _hidden_dim(dim, multiple_of, ffn_dim_multiplier=None):
    hidden = 4 * dim
    hidden = int(2 * hidden / 3)
    if ffn_dim_multiplier is not None:
        hidden = int(ffn_dim_multiplier * hidden)
    hidden = multiple_of * ((hidden + multiple_of - 1) // multiple_of)
    return hidden


if __name__ == "__main__":
    # Small ModelArgs-consistent shapes.
    batch, seq, dim, multiple_of = 2, 8, 128, 128
    hidden = _hidden_dim(dim, multiple_of)        # 4*128 -> 512 -> 341 -> 384

    key = jax.random.PRNGKey(0)
    kx, k1, k2, k3 = jax.random.split(key, 4)

    x = jax.random.normal(kx, (batch, seq, dim), dtype=jnp.float32)
    # nn.Linear weights are (out_features, in_features); forward does x @ W.T.
    w1 = jax.random.normal(k1, (hidden, dim), dtype=jnp.float32) * (1.0 / dim ** 0.5)
    w2 = jax.random.normal(k2, (dim, hidden), dtype=jnp.float32) * (1.0 / hidden ** 0.5)
    w3 = jax.random.normal(k3, (hidden, dim), dtype=jnp.float32) * (1.0 / dim ** 0.5)

    # Weight prep (transpose / cast / fuse) happens ONCE, outside the hot path.
    prepared = prepare_ffn_weights(w1, w2, w3)
    out = feed_forward_prepared(x, prepared)
    jax.block_until_ready(out)

    # Reference mimicking the kernel numerics (bf16 MXU operands, f32 accum,
    # exact sigmoid).  Remaining delta = EUP approx-reciprocal + one bf16 cast.
    x2d = x.reshape(batch * seq, dim)
    xb = x2d.astype(jnp.bfloat16)
    h1 = jnp.dot(xb, w1.T.astype(jnp.bfloat16), preferred_element_type=jnp.float32)
    h3 = jnp.dot(xb, w3.T.astype(jnp.bfloat16), preferred_element_type=jnp.float32)
    gated = (h1 * jax.nn.sigmoid(h1) * h3).astype(jnp.bfloat16)
    ref = jnp.dot(gated, w2.T.astype(jnp.bfloat16),
                  preferred_element_type=jnp.float32).astype(x.dtype)
    ref = ref.reshape(batch, seq, dim)

    assert out.shape == ref.shape
    assert jnp.allclose(out, ref, atol=5e-2, rtol=5e-2), "mismatch vs reference"

    print("KERNEL_OK")
</pallas_src>

<mosaic_0001>
module attributes {stable_mosaic.version = 11 : i64} {
  func.func @_ffn_resident_kernel(%arg0: i32, %arg1: memref<16x128xf32, #tpu.memory_space<vmem>>, %arg2: memref<128x768xbf16, #tpu.memory_space<vmem>>, %arg3: memref<384x128xbf16, #tpu.memory_space<vmem>>, %arg4: memref<16x128xf32, #tpu.memory_space<vmem>>) attributes {dimension_semantics = [#tpu.dimension_semantics<parallel>], iteration_bounds = array<i64: 1>, scalar_prefetch = 0 : i64, scratch_operands = 0 : i64, tpu.core_type = #tpu.core_type<tc>, window_params = [{transform_indices = @transform_0, window_bounds = array<i64: 16, 128>}, {pipeline_mode = #tpu.pipeline_mode<synchronous>, transform_indices = @transform_1, window_bounds = array<i64: 128, 768>}, {pipeline_mode = #tpu.pipeline_mode<synchronous>, transform_indices = @transform_2, window_bounds = array<i64: 384, 128>}, {transform_indices = @transform_3, window_bounds = array<i64: 16, 128>}]} {
    %c0 = arith.constant 0 : index
    %c0_0 = arith.constant 0 : index
    %0 = vector.load %arg1[%c0, %c0_0] : memref<16x128xf32, #tpu.memory_space<vmem>>, vector<16x128xf32>
    %1 = arith.truncf %0 : vector<16x128xf32> to vector<16x128xbf16>
    %cst = arith.constant 0.000000e+00 : f32
    %2 = vector.broadcast %cst : f32 to vector<16x128xf32>
    %c0_1 = arith.constant 0 : index
    %c0_2 = arith.constant 0 : index
    %3 = vector.load %arg4[%c0_1, %c0_2] : memref<16x128xf32, #tpu.memory_space<vmem>>, vector<16x128xf32>
    tpu.vector_store %arg4[%c0_1, %c0_2], %2 {strides = array<i32>} : memref<16x128xf32, #tpu.memory_space<vmem>>, vector<16x128xf32>,
    %c0_i32 = arith.constant 0 : i32
    %c768_i32 = arith.constant 768 : i32
    %4 = arith.muli %c0_i32, %c768_i32 : i32
    %5 = tpu.assume_multiple %4, 768 : i32
    %c384_i32 = arith.constant 384 : i32
    %6 = arith.muli %c0_i32, %c384_i32 : i32
    %7 = tpu.assume_multiple %6, 384 : i32
    %c0_3 = arith.constant 0 : index
    %8 = arith.index_cast %5 : i32 to index
    %9 = vector.load %arg2[%c0_3, %8] : memref<128x768xbf16, #tpu.memory_space<vmem>>, vector<128x768xbf16>
    %cst_4 = arith.constant dense<0.000000e+00> : vector<16x768xf32>
    %10 = tpu.matmul %1, %9, %cst_4 {dimension_numbers = #tpu.dot_dimension_numbers<[1], [0], [0], [1], [0, 0, 1, 1], [], []>} : vector<16x128xbf16>, vector<128x768xbf16>, vector<16x768xf32> -> vector<16x768xf32>
    %11 = vector.extract_strided_slice %10 {offsets = [0, 0], sizes = [16, 384], strides = [1, 1]} : vector<16x768xf32> to vector<16x384xf32>
    %12 = vector.extract_strided_slice %10 {offsets = [0, 384], sizes = [16, 384], strides = [1, 1]} : vector<16x768xf32> to vector<16x384xf32>
    %cst_5 = arith.constant 0.000000e+00 : f32
    %13 = vector.broadcast %cst_5 : f32 to vector<16x384xf32>
    %14 = arith.subf %13, %11 : vector<16x384xf32>
    %15 = math.exp %14 : vector<16x384xf32>
    %cst_6 = arith.constant 1.000000e+00 : f32
    %16 = vector.broadcast %cst_6 : f32 to vector<16x384xf32>
    %17 = arith.addf %16, %15 : vector<16x384xf32>
    %18 = tpu.reciprocal %17 {approx = true} : vector<16x384xf32> -> vector<16x384xf32>
    %19 = arith.mulf %11, %18 : vector<16x384xf32>
    %20 = arith.mulf %19, %12 : vector<16x384xf32>
    %21 = arith.truncf %20 : vector<16x384xf32> to vector<16x384xbf16>
    %c0_7 = arith.constant 0 : index
    %c0_8 = arith.constant 0 : index
    %22 = vector.load %arg4[%c0_7, %c0_8] : memref<16x128xf32, #tpu.memory_space<vmem>>, vector<16x128xf32>
    %23 = arith.index_cast %7 : i32 to index
    %c0_9 = arith.constant 0 : index
    %24 = vector.load %arg3[%23, %c0_9] : memref<384x128xbf16, #tpu.memory_space<vmem>>, vector<384x128xbf16>
    %cst_10 = arith.constant dense<0.000000e+00> : vector<16x128xf32>
    %25 = tpu.matmul %21, %24, %cst_10 {dimension_numbers = #tpu.dot_dimension_numbers<[1], [0], [0], [1], [0, 0, 1, 1], [], []>} : vector<16x384xbf16>, vector<384x128xbf16>, vector<16x128xf32> -> vector<16x128xf32>
    %26 = arith.addf %22, %25 : vector<16x128xf32>
    %c0_11 = arith.constant 0 : index
    %c0_12 = arith.constant 0 : index
    %27 = vector.load %arg4[%c0_11, %c0_12] : memref<16x128xf32, #tpu.memory_space<vmem>>, vector<16x128xf32>
    tpu.vector_store %arg4[%c0_11, %c0_12], %26 {strides = array<i32>} : memref<16x128xf32, #tpu.memory_space<vmem>>, vector<16x128xf32>,
    %c1_i32 = arith.constant 1 : i32
    return
  }
  func.func @transform_0(%arg0: i32) -> (i32, i32) {
    %c0_i32 = arith.constant 0 : i32
    %c0_i32_0 = arith.constant 0 : i32
    return %arg0, %c0_i32 : i32, i32
  }
  func.func @transform_1(%arg0: i32) -> (i32, i32) {
    %c0_i32 = arith.constant 0 : i32
    %c0_i32_0 = arith.constant 0 : i32
    %c0_i32_1 = arith.constant 0 : i32
    return %c0_i32, %c0_i32_0 : i32, i32
  }
  func.func @transform_2(%arg0: i32) -> (i32, i32) {
    %c0_i32 = arith.constant 0 : i32
    %c0_i32_0 = arith.constant 0 : i32
    %c0_i32_1 = arith.constant 0 : i32
    return %c0_i32, %c0_i32_0 : i32, i32
  }
  func.func @transform_3(%arg0: i32) -> (i32, i32) {
    %c0_i32 = arith.constant 0 : i32
    %c0_i32_0 = arith.constant 0 : i32
    return %arg0, %c0_i32 : i32, i32
  }
}

</mosaic_0001>

<bundles_post_ra>
// kernel: tpu_custom_call.1
= control target key start
LH: loop header
LB: loop body
LE: loop exit
PB: predicated region body
PF: predicated region fallthrough
CT: control target
= control target key end

     0   :  { %8 = vsyncpa [#allocation3], 0  ;;  %s1218_s0 = inlined_call_operand.hbm [shape: f32[16,128], index: 0, kind: input, shape index: {}]   ;;  %s1219_s1 = inlined_call_operand.hbm [shape: bf16[128,768], index: 1, kind: input, shape index: {}]   ;;  %s1220_s2 = inlined_call_operand.hbm [shape: bf16[384,128], index: 2, kind: input, shape index: {}]   ;;  %s1221_s3 = inlined_call_operand.hbm [shape: f32[16,128], index: 3, kind: output, shape index: {}]  }
   0x1   :  { %9 = vsyncpa [#allocation6], 0 }
   0x2   :  { %10 = vsyncpa [#allocation4], 0  ;;  %s1164_s12 = smov [#allocation5]  }
   0x3   :  { %s28_s13 = sshll.u32 %s1164_s12, 4  ;;  %s29_s13 = int_to_ptr.vmem [resolvable:$true] %s28_s13 }
   0x4   :  { %s1086_s14 = scalar_lea.vmem %s29_s13, 6144  ;;  %p1091_p1 = scmp.lt.s32.totalorder %s29_s13, %s29_s13 }
   0x5   :  { %p1087_p0 = scmp.ne.s32.totalorder %s29_s13, %s1086_s14  ;;  %p1092_p2 = scmp.lt.s32.totalorder %s1086_s14, %s1086_s14 }
   0x7   :  { %p1093_p3 = por %p1092_p2, %p1091_p1 }
   0x9   :  { %p1094_p4 = pnand %p1093_p3, %p1087_p0 }
   0xb   :  { %1097 = shalt.err (!%p1094_p4)
}
   0xc   :  { %s1165_s15 = smov 384   ;;  %s1166_s16 = smov 24  }
   0xd   :  { %34 = dma.hbm_to_vmem [thread:$0]  %s1219_s1, 6144, %s29_s13, [#allocation6], %s1165_s15, %s1165_s15, %s1166_s16  }
   0xe   :  { %s1167_s19 = smov [#allocation2]  }
   0xf   :  { %s16_s20 = sshll.u32 %s1167_s19, 4  ;;  %s17_s20 = int_to_ptr.vmem [resolvable:$true] %s16_s20 }
  0x10   :  { %s1106_s21 = scalar_lea.vmem %s17_s20, 256  ;;  %p1111_p6 = scmp.lt.s32.totalorder %s17_s20, %s17_s20 }
  0x11   :  { %p1107_p5 = scmp.ne.s32.totalorder %s17_s20, %s1106_s21  ;;  %p1112_p7 = scmp.lt.s32.totalorder %s1106_s21, %s1106_s21 }
  0x13   :  { %p1113_p8 = por %p1112_p7, %p1111_p6 }
  0x15   :  { %p1114_p9 = pnand %p1113_p8, %p1107_p5 }
  0x17   :  { %1117 = shalt.err (!%p1114_p9)
}
  0x18   :  { %s1168_s22 = smov 128   ;;  %s1169_s23 = smov 8  }
  0x19   :  { %22 = dma.hbm_to_vmem [thread:$0]  %s1218_s0, 256, %s17_s20, [#allocation3], %s1168_s22, %s1168_s22, %s1169_s23  }
  0x1a   :  { %s1170_s1 = smov [#allocation7]  }
  0x1b   :  { %s40_s26 = sshll.u32 %s1170_s1, 4  ;;  %s41_s26 = int_to_ptr.vmem [resolvable:$true] %s40_s26 }
  0x1c   :  { %s1126_s27 = scalar_lea.vmem %s41_s26, 3072  ;;  %p1131_p11 = scmp.lt.s32.totalorder %s41_s26, %s41_s26 }
  0x1d   :  { %p1127_p10 = scmp.ne.s32.totalorder %s41_s26, %s1126_s27  ;;  %p1132_p12 = scmp.lt.s32.totalorder %s1126_s27, %s1126_s27 }
  0x1f   :  { %p1133_p13 = por %p1132_p12, %p1131_p11 }
  0x21   :  { %p1134_p0 = pnand %p1133_p13, %p1127_p10 }
  0x23   :  { %1137 = shalt.err (!%p1134_p0)
}
  0x24   :  { %s1171_s28 = smov 64   ;;  %s1172_s29 = smov 4  }
  0x25   :  { %46 = dma.hbm_to_vmem [thread:$0]  %s1220_s2, 3072, %s41_s26, [#allocation6], %s1171_s28, %s1171_s28, %s1172_s29  }
  0x26   :  { %1158 = dma.done.wait [#allocation3], 256  }
  0x27   :  { %1159 = vsyncadd [#allocation3], 4294967040 }
  0x28   :  { %1160 = dma.done.wait [#allocation6], 9216  }
  0x29   :  { %1161 = vsyncadd [#allocation6], 4294958080  ;;  %v1173_v0 = vmov 0   ;;  %v958_v1 = vld [vmem:[#allocation5 + $0x154] ss:$24 sps:$4 sm:$0xff]   ;;  %v58_v34 = vld [vmem:[#allocation2 + $0x8] sm:$0xff] }
  0x2a   :  { %382 = vmatprep.mubr.bf16.mxu0 %v1173_v0  ;;  %425 = vmatprep.mubr.bf16.mxu1 %v1173_v0  ;;  %v960_v2 = vld [vmem:[#allocation5 + $0x15c] ss:$24 sps:$4 sm:$0xff]   ;;  %v962_v3 = vld [vmem:[#allocation5 + $0x150] ss:$24 sps:$4 sm:$0xff]   ;;  %v966_v6 = vld [vmem:[#allocation5 + $0x12c] ss:$24 sps:$4 sm:$0xff]  }
  0x2b   :  { %350 = vmatprep.subr.bf16.mxu0 %v958_v1  ;;  %v963_v4 = vld [vmem:[#allocation5 + $0x158] ss:$24 sps:$4 sm:$0xff]   ;;  %393 = vmatprep.subr.bf16.mxu1 %v960_v2  ;;  %v964_v5 = vld [vmem:[#allocation5 + $0x124] ss:$24 sps:$4 sm:$0xff]   ;;  %v969_v8 = vld [vmem:[#allocation5 + $0x128] ss:$24 sps:$4 sm:$0xff]  }
  0x2c   :  { %351 = vmatpush1.bf16.msra.mxu0 %v962_v3  ;;  %394 = vmatpush1.bf16.msra.mxu1 %v963_v4  ;;  %v968_v7 = vld [vmem:[#allocation5 + $0x120] ss:$24 sps:$4 sm:$0xff]   ;;  %v970_v9 = vld [vmem:[#allocation5 + $0xf4] ss:$24 sps:$4 sm:$0xff]   ;;  %v974_v11 = vld [vmem:[#allocation5 + $0xf0] ss:$24 sps:$4 sm:$0xff]  }
  0x2d   :  { %352 = vmatprep.subr.bf16.mxu0 %v964_v5  ;;  %395 = vmatprep.subr.bf16.mxu1 %v966_v6  ;;  %v972_v10 = vld [vmem:[#allocation5 + $0xfc] ss:$24 sps:$4 sm:$0xff]   ;;  %v975_v12 = vld [vmem:[#allocation5 + $0xf8] ss:$24 sps:$4 sm:$0xff]   ;;  %v978_v14 = vld [vmem:[#allocation5 + $0xcc] ss:$24 sps:$4 sm:$0xff]  }
  0x2e   :  { %v976_v13 = vld [vmem:[#allocation5 + $0xc4] ss:$24 sps:$4 sm:$0xff]   ;;  %v980_v15 = vld [vmem:[#allocation5 + $0xc0] ss:$24 sps:$4 sm:$0xff]   ;;  %v982_v17 = vld [vmem:[#allocation5 + $0x94] ss:$24 sps:$4 sm:$0xff]  }
  0x2f   :  { %v981_v16 = vld [vmem:[#allocation5 + $0xc8] ss:$24 sps:$4 sm:$0xff]   ;;  %v984_v18 = vld [vmem:[#allocation5 + $0x9c] ss:$24 sps:$4 sm:$0xff]   ;;  %v987_v20 = vld [vmem:[#allocation5 + $0x98] ss:$24 sps:$4 sm:$0xff]  }
  0x30   :  { %353 = vmatpush1.bf16.msra.mxu0 %v968_v7  ;;  %396 = vmatpush1.bf16.msra.mxu1 %v969_v8  ;;  %v986_v19 = vld [vmem:[#allocation5 + $0x90] ss:$24 sps:$4 sm:$0xff]   ;;  %v988_v21 = vld [vmem:[#allocation5 + $0x64] ss:$24 sps:$4 sm:$0xff]   ;;  %v992_v23 = vld [vmem:[#allocation5 + $0x60] ss:$24 sps:$4 sm:$0xff]  }
  0x31   :  { %354 = vmatprep.subr.bf16.mxu0 %v970_v9  ;;  %397 = vmatprep.subr.bf16.mxu1 %v972_v10  ;;  %v990_v22 = vld [vmem:[#allocation5 + $0x6c] ss:$24 sps:$4 sm:$0xff]   ;;  %v993_v24 = vld [vmem:[#allocation5 + $0x68] ss:$24 sps:$4 sm:$0xff]   ;;  %v996_v26 = vld [vmem:[#allocation5 + $0x3c] ss:$24 sps:$4 sm:$0xff]  }
  0x32   :  { %v994_v25 = vld [vmem:[#allocation5 + $0x34] ss:$24 sps:$4 sm:$0xff]   ;;  %v998_v27 = vld [vmem:[#allocation5 + $0x30] ss:$24 sps:$4 sm:$0xff]   ;;  %v1000_v29 = vld [vmem:[#allocation5 + $0x4] ss:$24 sps:$4 sm:$0xff]  }
  0x33   :  { %v999_v28 = vld [vmem:[#allocation5 + $0x38] ss:$24 sps:$4 sm:$0xff]   ;;  %v1002_v30 = vld [vmem:[#allocation5 + $0xc] ss:$24 sps:$4 sm:$0xff]   ;;  %v1005_v32 = vld [vmem:[#allocation5 + $0x8] ss:$24 sps:$4 sm:$0xff]  }
  0x34   :  { %355 = vmatpush1.bf16.msra.mxu0 %v974_v11  ;;  %398 = vmatpush1.bf16.msra.mxu1 %v975_v12  ;;  %v1004_v31 = vld [vmem:[#allocation5] ss:$24 sps:$4 sm:$0xff]   ;;  %v57_v33 = vld [vmem:[#allocation2] sm:$0xff]  ;;  %v1008_v35 = vld [vmem:[#allocation5 + $0x164] ss:$24 sps:$4 sm:$0xff]   ;;  %v1174_v53 = vmov 0.0  }
  0x35   :  { %356 = vmatprep.subr.bf16.mxu0 %v976_v13  ;;  %399 = vmatprep.subr.bf16.mxu1 %v978_v14  ;;  %v59_v36 = vpack.c.bf16 %v58_v34, %v57_v33  ;;  %v1006_v37 = vld [vmem:[#allocation5 + $0x160] ss:$24 sps:$4 sm:$0xff]   ;;  %v1011_v38 = vld [vmem:[#allocation5 + $0x134] ss:$24 sps:$4 sm:$0xff]   ;;  %v1009_v39 = vld [vmem:[#allocation5 + $0x130] ss:$24 sps:$4 sm:$0xff]  }
  0x36   :  { %v1014_v40 = vld [vmem:[#allocation5 + $0x104] ss:$24 sps:$4 sm:$0xff]   ;;  %v1012_v41 = vld [vmem:[#allocation5 + $0x100] ss:$24 sps:$4 sm:$0xff]   ;;  %v1017_v42 = vld [vmem:[#allocation5 + $0xd4] ss:$24 sps:$4 sm:$0xff]  }
  0x37   :  { %v1015_v43 = vld [vmem:[#allocation5 + $0xd0] ss:$24 sps:$4 sm:$0xff]   ;;  %v1020_v44 = vld [vmem:[#allocation5 + $0xa4] ss:$24 sps:$4 sm:$0xff]   ;;  %v1018_v45 = vld [vmem:[#allocation5 + $0xa0] ss:$24 sps:$4 sm:$0xff]  }
  0x38   :  { %357 = vmatpush1.bf16.msra.mxu0 %v980_v15  ;;  %400 = vmatpush1.bf16.msra.mxu1 %v981_v16  ;;  %v1023_v46 = vld [vmem:[#allocation5 + $0x74] ss:$24 sps:$4 sm:$0xff]   ;;  %v1021_v47 = vld [vmem:[#allocation5 + $0x70] ss:$24 sps:$4 sm:$0xff]   ;;  %v1026_v48 = vld [vmem:[#allocation5 + $0x44] ss:$24 sps:$4 sm:$0xff]  }
  0x39   :  { %358 = vmatprep.subr.bf16.mxu0 %v982_v17  ;;  %401 = vmatprep.subr.bf16.mxu1 %v984_v18  ;;  %v1024_v49 = vld [vmem:[#allocation5 + $0x40] ss:$24 sps:$4 sm:$0xff]   ;;  %v1029_v50 = vld [vmem:[#allocation5 + $0x14] ss:$24 sps:$4 sm:$0xff]   ;;  %v1027_v51 = vld [vmem:[#allocation5 + $0x10] ss:$24 sps:$4 sm:$0xff]  }
  0x3a   :  { %v1030_v52 = vld [vmem:[#allocation7 + $0xb8] sm:$0xff]   ;;  %v1033_v56 = vld [vmem:[#allocation7 + $0xb0] sm:$0xff]   ;;  %v1036_v59 = vld [vmem:[#allocation7 + $0xa8] sm:$0xff]   ;;  %vm1175_vm0 = vmmov 0   ;;  %s1176_s0 = smov [#allocation8]  }
  0x3b   :  { %v1031_v54 = vld [vmem:[#allocation7 + $0x78] sm:$0xff]   ;;  %v1034_v57 = vld [vmem:[#allocation7 + $0x70] sm:$0xff]   ;;  %v1037_v60 = vld [vmem:[#allocation7 + $0x68] sm:$0xff]   ;;  %s809_s2 = sshll.u32 %s1176_s0, 4  ;;  %s810_s2 = int_to_ptr.vmem [resolvable:$true] %s809_s2 }
  0x3c   :  { %359 = vmatpush1.bf16.msra.mxu0 %v986_v19  ;;  %402 = vmatpush1.bf16.msra.mxu1 %v987_v20  ;;  %v1032_v55 = vld [vmem:[#allocation7 + $0x38] sm:$0xff]   ;;  %v1035_v58 = vld [vmem:[#allocation7 + $0x30] sm:$0xff]   ;;  %v1038_v61 = vld [vmem:[#allocation7 + $0x28] sm:$0xff]   ;;  %s1138_s5 = scalar_lea.vmem %s810_s2, 256  ;;  %p1143_p2 = scmp.lt.s32.totalorder %s810_s2, %s810_s2 }
  0x3d   :  { %360 = vmatprep.subr.bf16.mxu0 %v988_v21  ;;  %403 = vmatprep.subr.bf16.mxu1 %v990_v22  ;;  %v1039_v62 = vld [vmem:[#allocation7 + $0xa0] sm:$0xff]   ;;  %v1042_v1 = vld [vmem:[#allocation7 + $0x98] sm:$0xff]   ;;  %v1045_v4 = vld [vmem:[#allocation7 + $0x90] sm:$0xff]   ;;  %p1139_p1 = scmp.ne.s32.totalorder %s810_s2, %s1138_s5  ;;  %p1144_p3 = scmp.lt.s32.totalorder %s1138_s5, %s1138_s5 }
  0x3e   :  { %v1040_v63 = vld [vmem:[#allocation7 + $0x60] sm:$0xff]   ;;  %v1043_v2 = vld [vmem:[#allocation7 + $0x58] sm:$0xff]   ;;  %v1046_v5 = vld [vmem:[#allocation7 + $0x50] sm:$0xff]  }
  0x3f   :  { %v1044_v3 = vld [vmem:[#allocation7 + $0x18] sm:$0xff]   ;;  %v1047_v6 = vld [vmem:[#allocation7 + $0x10] sm:$0xff]   ;;  %v1048_v7 = vld [vmem:[#allocation7 + $0x88] sm:$0xff]   ;;  %p1145_p4 = por %p1144_p3, %p1143_p2 }
  0x40   :  { %361 = vmatpush1.bf16.msra.mxu0 %v992_v23  ;;  %404 = vmatpush1.bf16.msra.mxu1 %v993_v24  ;;  %v1049_v8 = vld [vmem:[#allocation7 + $0x48] sm:$0xff]   ;;  %v1051_v10 = vld [vmem:[#allocation7 + $0x80] sm:$0xff]  }
  0x41   :  { %362 = vmatprep.subr.bf16.mxu0 %v994_v25  ;;  %405 = vmatprep.subr.bf16.mxu1 %v996_v26  ;;  %v1050_v9 = vld [vmem:[#allocation7 + $0x8] sm:$0xff]   ;;  %v1052_v11 = vld [vmem:[#allocation7 + $0x40] sm:$0xff]   ;;  %p1146_p5 = pnand %p1145_p4, %p1139_p1 }
  0x42   :  { %v1053_v12 = vld [vmem:[#allocation7] sm:$0xff]  }
  0x44   :  { %363 = vmatpush1.bf16.msra.mxu0 %v998_v27  ;;  %406 = vmatpush1.bf16.msra.mxu1 %v999_v28 }
  0x45   :  { %364 = vmatprep.subr.bf16.mxu0 %v1000_v29  ;;  %407 = vmatprep.subr.bf16.mxu1 %v1002_v30 }
  0x48   :  { %365 = vmatpush1.bf16.msra.mxu0 %v1004_v31  ;;  %408 = vmatpush1.bf16.msra.mxu1 %v1005_v32 }
  0x49   :  { %436 = vmatprep.subr.bf16.mxu0 %v1008_v35  ;;  %894 = vmatprep.subr.bf16.mxu1 %v1031_v54 }
  0x4b   :  { %383 = vmatmul.mubr.bf16.vlgmr.msra.gmra.mxu0 %v59_v36  ;;  %426 = vmatmul.mubr.bf16.vlgmr.msra.gmra.mxu1 %v59_v36 }
  0x4c   :  { %437 = vmatpush1.bf16.msra.mxu0 %v1006_v37  ;;  %468 = vmatprep.mubr.bf16.mxu0 %v1173_v0  ;;  %v1041_v0 = vld [vmem:[#allocation7 + $0x20] sm:$0xff]  }
  0x4d   :  { %438 = vmatprep.subr.bf16.mxu0 %v1011_v38  ;;  %895 = vmatpush3.bf16.msra.mxu1 %v1032_v55 }
  0x4e   :  { %896 = vmatprep.subr.bf16.mxu1 %v1034_v57 }
  0x50   :  { %439 = vmatpush1.bf16.msra.mxu0 %v1009_v39 }
  0x51   :  { %440 = vmatprep.subr.bf16.mxu0 %v1014_v40  ;;  %897 = vmatpush3.bf16.msra.mxu1 %v1035_v58 }
  0x52   :  { %898 = vmatprep.subr.bf16.mxu1 %v1037_v60 }
  0x54   :  { %441 = vmatpush1.bf16.msra.mxu0 %v1012_v41 }
  0x55   :  { %442 = vmatprep.subr.bf16.mxu0 %v1017_v42  ;;  %899 = vmatpush3.bf16.msra.mxu1 %v1038_v61 }
  0x56   :  { %900 = vmatprep.subr.bf16.mxu1 %v1040_v63 }
  0x58   :  { %443 = vmatpush1.bf16.msra.mxu0 %v1015_v43 }
  0x59   :  { %444 = vmatprep.subr.bf16.mxu0 %v1020_v44  ;;  %901 = vmatpush3.bf16.msra.mxu1 %v1041_v0 }
  0x5a   :  { %902 = vmatprep.subr.bf16.mxu1 %v1043_v2 }
  0x5c   :  { %445 = vmatpush1.bf16.msra.mxu0 %v1018_v45 }
  0x5d   :  { %446 = vmatprep.subr.bf16.mxu0 %v1023_v46  ;;  %903 = vmatpush3.bf16.msra.mxu1 %v1044_v3 }
  0x5e   :  { %904 = vmatprep.subr.bf16.mxu1 %v1046_v5 }
  0x60   :  { %447 = vmatpush1.bf16.msra.mxu0 %v1021_v47 }
  0x61   :  { %448 = vmatprep.subr.bf16.mxu0 %v1026_v48  ;;  %905 = vmatpush3.bf16.msra.mxu1 %v1047_v6 }
  0x62   :  { %906 = vmatprep.subr.bf16.mxu1 %v1049_v8 }
  0x64   :  { %449 = vmatpush1.bf16.msra.mxu0 %v1024_v49 }
  0x65   :  { %450 = vmatprep.subr.bf16.mxu0 %v1029_v50  ;;  %907 = vmatpush3.bf16.msra.mxu1 %v1050_v9 }
  0x66   :  { %908 = vmatprep.subr.bf16.mxu1 %v1052_v11 }
  0x68   :  { %451 = vmatpush1.bf16.msra.mxu0 %v1027_v51 }
  0x69   :  { %925 = vmatprep.subr.bf16.mxu0 %v1174_v53  ;;  %909 = vmatpush3.bf16.msra.mxu1 %v1053_v12 }
  0x6b   :  { %469 = vmatmul.mubr.bf16.vlgmr.msra.gmra.mxu0 %v59_v36 }
  0x6c   :  { %926 = vmatpush3.bf16.msra.mxu0 %v1030_v52  ;;  %941 = vmatprep.mubr.msk.bf16.mxu0 %vm1175_vm0, %v1174_v53 }
  0x6d   :  { %927 = vmatprep.subr.bf16.mxu0 %v1174_v53 }
  0x70   :  { %928 = vmatpush3.bf16.msra.mxu0 %v1033_v56 }
  0x71   :  { %929 = vmatprep.subr.bf16.mxu0 %v1174_v53 }
  0x74   :  { %930 = vmatpush3.bf16.msra.mxu0 %v1036_v59 }
  0x75   :  { %931 = vmatprep.subr.bf16.mxu0 %v1174_v53 }
  0x78   :  { %932 = vmatpush3.bf16.msra.mxu0 %v1039_v62 }
  0x79   :  { %933 = vmatprep.subr.bf16.mxu0 %v1174_v53 }
  0x7c   :  { %934 = vmatpush3.bf16.msra.mxu0 %v1042_v1 }
  0x7d   :  { %935 = vmatprep.subr.bf16.mxu0 %v1174_v53 }
  0x80   :  { %936 = vmatpush3.bf16.msra.mxu0 %v1045_v4 }
  0x81   :  { %937 = vmatprep.subr.bf16.mxu0 %v1174_v53 }
  0x84   :  { %938 = vmatpush3.bf16.msra.mxu0 %v1048_v7 }
  0x85   :  { %939 = vmatprep.subr.bf16.mxu0 %v1174_v53 }
  0x88   :  { %940 = vmatpush3.bf16.msra.mxu0 %v1051_v10 }
 0x10b   :  { %v384_v13 = vpop.f32.mrf.mxu0  ;;  %v427_v14 = vpop.f32.mrf.mxu1 }
 0x10c   :  { %v479_v15 = vsub.f32 0.0, %v384_v13  ;;  %v481_v16 = vsub.f32 0.0, %v427_v14 }
 0x10d   :  { %v386_v17 = vpop.f32.mrf.mxu0  ;;  %v429_v18 = vpop.f32.mrf.mxu1 }
 0x10e   :  { %v485_v19 = vmul.f32 1.442695, %v479_v15  ;;  %v489_v20 = vmul.f32 1.442695, %v481_v16  ;;  %v480_v21 = vsub.f32 0.0, %v386_v17 }
 0x10f   :  { %v388_v22 = vpop.f32.mrf.mxu0  ;;  %v431_v23 = vpop.f32.mrf.mxu1 }
 0x110   :  { %1054 = vpow2.f32 %v485_v19  ;;  %v487_v24 = vmul.f32 1.442695, %v480_v21  ;;  %v482_v25 = vsub.f32 0.0, %v388_v22  ;;  %v484_v26 = vsub.f32 0.0, %v431_v23 }
 0x111   :  { %1056 = vpow2.f32 %v489_v20  ;;  %v390_v27 = vpop.f32.mrf.mxu0  ;;  %v433_v59 = vpop.f32.mrf.mxu1 }
 0x112   :  { %1058 = vpow2.f32 %v487_v24  ;;  %v491_v28 = vmul.f32 1.442695, %v482_v25  ;;  %v495_v29 = vmul.f32 1.442695, %v484_v26  ;;  %v483_v30 = vsub.f32 0.0, %v390_v27 }
 0x114   :  { %1060 = vpow2.f32 %v491_v28  ;;  %v493_v31 = vmul.f32 1.442695, %v483_v30 }
 0x115   :  { %1062 = vpow2.f32 %v495_v29 }
 0x116   :  { %1064 = vpow2.f32 %v493_v31 }
 0x11d   :  { %v1055_v32 = vpop.eup %1054 }
 0x11e   :  { %v1057_v33 = vpop.eup %1056  ;;  %v497_v35 = vadd.f32 1.0, %v1055_v32 }
 0x11f   :  { %v1059_v34 = vpop.eup %1058  ;;  %v499_v36 = vadd.f32 1.0, %v1057_v33 }
 0x120   :  { %v498_v37 = vadd.f32 1.0, %v1059_v34 }
 0x121   :  { %v1061_v38 = vpop.eup %1060  ;;  %1066 = vrcp.f32 %v499_v36 }
 0x122   :  { %v1063_v39 = vpop.eup %1062  ;;  %1068 = vrcp.f32 %v498_v37  ;;  %v500_v40 = vadd.f32 1.0, %v1061_v38 }
 0x123   :  { %v1065_v41 = vpop.eup %1064  ;;  %1070 = vrcp.f32 %v497_v35  ;;  %v502_v42 = vadd.f32 1.0, %v1063_v39 }
 0x124   :  { %1072 = vrcp.f32 %v500_v40  ;;  %v501_v43 = vadd.f32 1.0, %v1065_v41 }
 0x125   :  { %1074 = vrcp.f32 %v502_v42 }
 0x126   :  { %1076 = vrcp.f32 %v501_v43 }
 0x12b   :  { %v470_v44 = vpop.f32.mrf.mxu0 }
 0x12d   :  { %v472_v45 = vpop.f32.mrf.mxu0 }
 0x12e   :  { %v1067_v46 = vpop.eup %1066 }
 0x12f   :  { %v1069_v47 = vpop.eup %1068  ;;  %v474_v49 = vpop.f32.mrf.mxu0  ;;  %v511_v51 = vmul.f32 %v1067_v46, %v427_v14 }
 0x130   :  { %v1071_v48 = vpop.eup %1070  ;;  %v510_v53 = vmul.f32 %v1069_v47, %v386_v17 }
 0x131   :  { %v1073_v50 = vpop.eup %1072  ;;  %v509_v56 = vmul.f32 %v1071_v48, %v384_v13  ;;  %v476_v60 = vpop.f32.mrf.mxu0  ;;  %v517_v62 = vmul.f32 %v511_v51, %v472_v45 }
 0x132   :  { %v1075_v52 = vpop.eup %1074  ;;  %v512_v54 = vmul.f32 %v1073_v50, %v388_v22  ;;  %v516_v0 = vmul.f32 %v510_v53, %v470_v44 }
 0x133   :  { %v1077_v55 = vpop.eup %1076  ;;  %v514_v57 = vmul.f32 %v1075_v52, %v431_v23  ;;  %v515_v2 = vmul.f32 %v509_v56, %v429_v18 }
 0x134   :  { %v513_v58 = vmul.f32 %v1077_v55, %v390_v27  ;;  %v518_v61 = vmul.f32 %v512_v54, %v433_v59 }
 0x135   :  { %v520_v63 = vmul.f32 %v514_v57, %v476_v60 }
 0x136   :  { %v519_v1 = vmul.f32 %v513_v58, %v474_v49  ;;  %v521_v5 = vpack.c.bf16 %v518_v61, %v515_v2 }
 0x137   :  { %v523_v3 = vpack.c.bf16 %v520_v63, %v517_v62 }
 0x138   :  { %v522_v4 = vpack.c.bf16 %v519_v1, %v516_v0 }
 0x139   :  { %942 = vmatmul.mubr.bf16.vlgmr.msra.gmra.mxu0 %v523_v3 }
 0x13a   :  { %750 = vmatprep.mubr.bf16.mxu1 %v522_v4 }
 0x13b   :  { %751 = vmatmul.mubr.bf16.vlgmr.msra.gmra.mxu1 %v521_v5 }
 0x1f9   :  { %v793_v6 = vpop.f32.mrf.mxu0 }
 0x1fb   :  { %v943_v7 = vpop.f32.mrf.mxu0  ;;  %v910_v8 = vpop.f32.mrf.mxu1 }
 0x1fd   :  { %v796_v9 = vpop.f32.mrf.mxu0  ;;  %v911_v10 = vpop.f32.mrf.mxu1 }
 0x1fe   :  { %v912_v11 = vadd.f32 %v911_v10, %v910_v8 }
 0x1ff   :  { %v944_v12 = vpop.f32.mrf.mxu0  ;;  %v913_v13 = vpop.f32.mrf.mxu1 }
 0x200   :  { %v794_v14 = vadd.f32 %v912_v11, %v793_v6 }
 0x201   :  { %v914_v15 = vpop.f32.mrf.mxu1 }
 0x202   :  { %v915_v16 = vadd.f32 %v914_v15, %v913_v13  ;;  %802 = vst [vmem:[#allocation8] sm:$0xff] %v794_v14 }
 0x204   :  { %v797_v17 = vadd.f32 %v915_v16, %v796_v9 }
 0x206   :  { %803 = vst [vmem:[#allocation8 + $0x8] sm:$0xff] %v797_v17 }
 0x207   :  { %1149 = shalt.err (!%p1146_p5)
}
 0x208   :  { %815 = dma.vmem_to_hbm [thread:$0]  %s810_s2, 256, %s1221_s3, [#allocation4], %s1168_s22, %s1168_s22, %s1169_s23  }
 0x209   :  { %1162 = dma.done.wait [#allocation4], 256  }
 0x20a   :  { %1163 = vsyncadd [#allocation4], 4294967040 }
 0x20b   :  { %819 = vsyncpa [#allocation3], 1 }
 0x20c   :  { %820 = vsyncpa [#allocation6], 1 }
 0x20d   :  { %821 = vsyncpa [#allocation4], 1 }

</bundles_post_ra>
